<compile_context>
chip_gen: v7x
topology: tpu7x:2x2x1
jax: 0.10.0
libtpu: 0.0.40
codegen_flags: <defaults>
</compile_context>

<pallas_src>
import jax
import jax.numpy as jnp
from jax.experimental import pallas as pl
from jax.experimental.pallas import tpu as pltpu


def _round_up(n, m):
    return ((n + m - 1) // m) * m


def _make_kernel(fc2_on_mxu):
    def roiua_kernel(x_ref, w1_ref, b1_ref, w2_ref, b2_ref, th_ref,
                     s_ref, sth_ref):
        # x: (tb, 512) f32 (native dtype streamed from HBM) -> bf16 on VPU.
        x = x_ref[...].astype(jnp.bfloat16)

        # fc_r1: bf16 MXU matmul with f32 accumulation, f32 bias + ReLU (VPU).
        h = jnp.dot(x, w1_ref[...], preferred_element_type=jnp.float32)
        h = jnp.maximum(h + b1_ref[...], 0.0)                  # (tb, 256) f32

        if fc2_on_mxu:
            # fc_r2 on the MXU: w2 zero-padded to (256,128) bf16; column 0 = z.
            z = jnp.dot(h.astype(jnp.bfloat16), w2_ref[...],
                        preferred_element_type=jnp.float32)[:, 0:1]
        else:
            # VPU multiply + XLU lane-reduce path (for bf16-fed v5e).
            z = jnp.sum(h * w2_ref[...], axis=-1, keepdims=True)

        z = z + b2_ref[0, 0]
        s = jax.nn.sigmoid(z)                                   # EUP exp
        s_ref[...] = s
        sth_ref[...] = s - th_ref[0, 0]

    return roiua_kernel


def _choose_tile(batch, tile_b):
    tb = min(tile_b, _round_up(batch, 8))
    if batch > 8:
        # keep >= 2 grid steps so the "parallel" axis splits across v7x's 2 TCs
        tb = min(tb, _round_up((batch + 1) // 2, 8))
    return max(8, _round_up(tb, 8))


def roiua_forward(x, w1_t, b1, w2_row, b2, thresh, *,
                  tile_b=2048, fc2_on_mxu=True):
    """x: (B, 512) f32.  w1_t: (512, 256) f32.  b1: (1, 256) f32.
    w2_row: (1, 256) f32.  b2, thresh: (1, 1) f32.
    Returns (s, s - thresh), each f32 (B, 1)."""
    batch, d_in = x.shape
    d_hidden = w1_t.shape[1]

    tb = _choose_tile(batch, tile_b)
    grid = (pl.cdiv(batch, tb),)        # ragged tail handled by Pallas masking

    vmem = pltpu.MemorySpace.VMEM
    smem = pltpu.MemorySpace.SMEM

    # Weights are tiny and VMEM-resident; casting them here is negligible
    # (the review's HBM concern applies to x, which is no longer touched).
    w1b = w1_t.astype(jnp.bfloat16)
    if fc2_on_mxu:
        w2_in = jnp.zeros((d_hidden, 128), jnp.bfloat16).at[:, 0].set(
            w2_row.reshape(d_hidden).astype(jnp.bfloat16))
        w2_spec = pl.BlockSpec((d_hidden, 128), lambda i: (0, 0),
                               memory_space=vmem)
    else:
        w2_in = w2_row
        w2_spec = pl.BlockSpec((1, d_hidden), lambda i: (0, 0),
                               memory_space=vmem)

    out_shape = (
        jax.ShapeDtypeStruct((batch, 1), jnp.float32),  # s
        jax.ShapeDtypeStruct((batch, 1), jnp.float32),  # s - thresh
    )

    f = pl.pallas_call(
        _make_kernel(fc2_on_mxu),
        out_shape=out_shape,
        grid=grid,
        in_specs=[
            # x tile streams over the batch grid axis (auto double-buffered).
            pl.BlockSpec((tb, d_in), lambda i: (i, 0), memory_space=vmem),
            # Weights / biases: constant index_map -> fetched once, resident.
            pl.BlockSpec((d_in, d_hidden), lambda i: (0, 0), memory_space=vmem),
            pl.BlockSpec((1, d_hidden), lambda i: (0, 0), memory_space=vmem),
            w2_spec,
            # Scalars live in SMEM for the whole call.
            pl.BlockSpec(memory_space=smem),   # b2 (1, 1)
            pl.BlockSpec(memory_space=smem),   # thresh (1, 1)
        ],
        out_specs=(
            pl.BlockSpec((tb, 1), lambda i: (i, 0), memory_space=vmem),
            pl.BlockSpec((tb, 1), lambda i: (i, 0), memory_space=vmem),
        ),
        compiler_params=pltpu.CompilerParams(
            dimension_semantics=("parallel",),     # shards batch over v7x TCs
            vmem_limit_bytes=32 * 1024 * 1024,     # room for 2 x 4 MiB x-blocks
        ),
    )
    return f(x, w1b, b1, w2_in, b2, thresh)


def init_params(key, d_in=512, d_hidden=256, thresh=0.9):
    k1, k2 = jax.random.split(key)
    # nn.init.normal_(weight, mean=0, std=0.01); bias = 0
    w1 = 0.01 * jax.random.normal(k1, (d_hidden, d_in), dtype=jnp.float32)
    b1 = jnp.zeros((1, d_hidden), dtype=jnp.float32)
    w2 = 0.01 * jax.random.normal(k2, (1, d_hidden), dtype=jnp.float32)
    b2 = jnp.zeros((1, 1), dtype=jnp.float32)
    th = jnp.full((1, 1), thresh, dtype=jnp.float32)
    # fc_r1 weight passed pre-transposed (in, out) so the kernel does x @ W.
    return w1.T, b1, w2, b2, th


def _reference(x, w1_t, b1, w2_row, b2, thresh):
    # True f32 reference matching the PyTorch module.
    hp = jax.lax.Precision.HIGHEST
    h = jnp.maximum(jnp.dot(x, w1_t, precision=hp) + b1, 0.0)
    z = jnp.dot(h, w2_row.T, precision=hp) + b2[0, 0]
    s = jax.nn.sigmoid(z)
    return s, s - thresh[0, 0]


if __name__ == "__main__":
    key = jax.random.PRNGKey(0)
    k_x, k_x2, k_p = jax.random.split(key, 3)

    w1_t, b1, w2_row, b2, th = init_params(k_p)

    # Small single-tile case.
    batch, d_f = 8, 512
    x = jax.random.normal(k_x, (batch, d_f), dtype=jnp.float32)
    s_out, s_out_th = roiua_forward(x, w1_t, b1, w2_row, b2, th)
    jax.block_until_ready((s_out, s_out_th))

    s_ref, sth_ref = _reference(x, w1_t, b1, w2_row, b2, th)
    assert s_out.shape == (batch, 1) and s_out_th.shape == (batch, 1)
    assert jnp.allclose(s_out, s_ref, atol=1e-3)
    assert jnp.allclose(s_out_th, sth_ref, atol=1e-3)

    # Ragged multi-tile case (exercises cdiv grid + masked tail, no jnp.pad).
    batch2 = 104
    x2 = jax.random.normal(k_x2, (batch2, d_f), dtype=jnp.float32)
    s2, sth2 = roiua_forward(x2, w1_t, b1, w2_row, b2, th, tile_b=64)
    jax.block_until_ready((s2, sth2))
    s2_ref, sth2_ref = _reference(x2, w1_t, b1, w2_row, b2, th)
    assert s2.shape == (batch2, 1) and sth2.shape == (batch2, 1)
    assert jnp.allclose(s2, s2_ref, atol=1e-3)
    assert jnp.allclose(sth2, sth2_ref, atol=1e-3)

    print("KERNEL_OK")
</pallas_src>

<mosaic_0001>
module attributes {stable_mosaic.version = 11 : i64} {
  func.func @roiua_kernel(%arg0: i32, %arg1: memref<8x512xf32, #tpu.memory_space<vmem>>, %arg2: memref<512x256xbf16, #tpu.memory_space<vmem>>, %arg3: memref<1x256xf32, #tpu.memory_space<vmem>>, %arg4: memref<256x128xbf16, #tpu.memory_space<vmem>>, %arg5: memref<1x1xf32, #tpu.memory_space<smem>>, %arg6: memref<1x1xf32, #tpu.memory_space<smem>>, %arg7: memref<8x1xf32, #tpu.memory_space<vmem>>, %arg8: memref<8x1xf32, #tpu.memory_space<vmem>>) attributes {dimension_semantics = [#tpu.dimension_semantics<parallel>], iteration_bounds = array<i64: 1>, scalar_prefetch = 0 : i64, scratch_operands = 0 : i64, tpu.core_type = #tpu.core_type<tc>, window_params = [{transform_indices = @transform_0, window_bounds = array<i64: 8, 512>}, {pipeline_mode = #tpu.pipeline_mode<synchronous>, transform_indices = @transform_1, window_bounds = array<i64: 512, 256>}, {pipeline_mode = #tpu.pipeline_mode<synchronous>, transform_indices = @transform_2, window_bounds = array<i64: 1, 256>}, {pipeline_mode = #tpu.pipeline_mode<synchronous>, transform_indices = @transform_3, window_bounds = array<i64: 256, 128>}, {transform_indices = @transform_4, window_bounds = array<i64: 1, 1>}, {transform_indices = @transform_5, window_bounds = array<i64: 1, 1>}, {transform_indices = @transform_6, window_bounds = array<i64: 8, 1>}, {transform_indices = @transform_7, window_bounds = array<i64: 8, 1>}]} {
    %c0 = arith.constant 0 : index
    %c0_0 = arith.constant 0 : index
    %0 = vector.load %arg1[%c0, %c0_0] : memref<8x512xf32, #tpu.memory_space<vmem>>, vector<8x512xf32>
    %1 = arith.truncf %0 : vector<8x512xf32> to vector<8x512xbf16>
    %c0_1 = arith.constant 0 : index
    %c0_2 = arith.constant 0 : index
    %2 = vector.load %arg2[%c0_1, %c0_2] : memref<512x256xbf16, #tpu.memory_space<vmem>>, vector<512x256xbf16>
    %cst = arith.constant dense<0.000000e+00> : vector<8x256xf32>
    %3 = tpu.matmul %1, %2, %cst {dimension_numbers = #tpu.dot_dimension_numbers<[1], [0], [0], [1], [0, 0, 1, 1], [], []>} : vector<8x512xbf16>, vector<512x256xbf16>, vector<8x256xf32> -> vector<8x256xf32>
    %c0_3 = arith.constant 0 : index
    %c0_4 = arith.constant 0 : index
    %4 = vector.load %arg3[%c0_3, %c0_4] : memref<1x256xf32, #tpu.memory_space<vmem>>, vector<1x256xf32>
    %5 = vector.broadcast %4 : vector<1x256xf32> to vector<8x256xf32>
    %6 = arith.addf %3, %5 : vector<8x256xf32>
    %cst_5 = arith.constant 0.000000e+00 : f32
    %7 = vector.broadcast %cst_5 : f32 to vector<8x256xf32>
    %8 = arith.maximumf %6, %7 : vector<8x256xf32>
    %9 = arith.truncf %8 : vector<8x256xf32> to vector<8x256xbf16>
    %c0_6 = arith.constant 0 : index
    %c0_7 = arith.constant 0 : index
    %10 = vector.load %arg4[%c0_6, %c0_7] : memref<256x128xbf16, #tpu.memory_space<vmem>>, vector<256x128xbf16>
    %cst_8 = arith.constant dense<0.000000e+00> : vector<8x128xf32>
    %11 = tpu.matmul %9, %10, %cst_8 {dimension_numbers = #tpu.dot_dimension_numbers<[1], [0], [0], [1], [0, 0, 1, 1], [], []>} : vector<8x256xbf16>, vector<256x128xbf16>, vector<8x128xf32> -> vector<8x128xf32>
    %12 = vector.extract_strided_slice %11 {offsets = [0, 0], sizes = [8, 1], strides = [1, 1]} : vector<8x128xf32> to vector<8x1xf32>
    %c0_9 = arith.constant 0 : index
    %c0_10 = arith.constant 0 : index
    %13 = memref.load %arg5[%c0_9, %c0_10] : memref<1x1xf32, #tpu.memory_space<smem>>
    %14 = vector.broadcast %13 : f32 to vector<8x1xf32>
    %15 = arith.addf %12, %14 : vector<8x1xf32>
    %16 = arith.negf %15 : vector<8x1xf32>
    %17 = math.exp %16 : vector<8x1xf32>
    %cst_11 = arith.constant 1.000000e+00 : f32
    %18 = vector.broadcast %cst_11 : f32 to vector<8x1xf32>
    %19 = arith.addf %18, %17 : vector<8x1xf32>
    %20 = arith.divf %18, %19 : vector<8x1xf32>
    %c0_12 = arith.constant 0 : index
    %c0_13 = arith.constant 0 : index
    %21 = vector.load %arg7[%c0_12, %c0_13] : memref<8x1xf32, #tpu.memory_space<vmem>>, vector<8x1xf32>
    tpu.vector_store %arg7[%c0_12, %c0_13], %20 {strides = array<i32>} : memref<8x1xf32, #tpu.memory_space<vmem>>, vector<8x1xf32>,
    %c0_14 = arith.constant 0 : index
    %c0_15 = arith.constant 0 : index
    %22 = memref.load %arg6[%c0_14, %c0_15] : memref<1x1xf32, #tpu.memory_space<smem>>
    %23 = vector.broadcast %22 : f32 to vector<8x1xf32>
    %24 = arith.subf %20, %23 : vector<8x1xf32>
    %c0_16 = arith.constant 0 : index
    %c0_17 = arith.constant 0 : index
    %25 = vector.load %arg8[%c0_16, %c0_17] : memref<8x1xf32, #tpu.memory_space<vmem>>, vector<8x1xf32>
    tpu.vector_store %arg8[%c0_16, %c0_17], %24 {strides = array<i32>} : memref<8x1xf32, #tpu.memory_space<vmem>>, vector<8x1xf32>,
    return
  }
  func.func @transform_0(%arg0: i32) -> (i32, i32) {
    %c0_i32 = arith.constant 0 : i32
    %c0_i32_0 = arith.constant 0 : i32
    return %arg0, %c0_i32 : i32, i32
  }
  func.func @transform_1(%arg0: i32) -> (i32, i32) {
    %c0_i32 = arith.constant 0 : i32
    %c0_i32_0 = arith.constant 0 : i32
    %c0_i32_1 = arith.constant 0 : i32
    return %c0_i32, %c0_i32_0 : i32, i32
  }
  func.func @transform_2(%arg0: i32) -> (i32, i32) {
    %c0_i32 = arith.constant 0 : i32
    %c0_i32_0 = arith.constant 0 : i32
    %c0_i32_1 = arith.constant 0 : i32
    return %c0_i32, %c0_i32_0 : i32, i32
  }
  func.func @transform_3(%arg0: i32) -> (i32, i32) {
    %c0_i32 = arith.constant 0 : i32
    %c0_i32_0 = arith.constant 0 : i32
    %c0_i32_1 = arith.constant 0 : i32
    return %c0_i32, %c0_i32_0 : i32, i32
  }
  func.func @transform_4(%arg0: i32) -> (i32, i32) {
    %c0_i32 = arith.constant 0 : i32
    %c0_i32_0 = arith.constant 0 : i32
    %c0_i32_1 = arith.constant 0 : i32
    return %c0_i32, %c0_i32_0 : i32, i32
  }
  func.func @transform_5(%arg0: i32) -> (i32, i32) {
    %c0_i32 = arith.constant 0 : i32
    %c0_i32_0 = arith.constant 0 : i32
    %c0_i32_1 = arith.constant 0 : i32
    return %c0_i32, %c0_i32_0 : i32, i32
  }
  func.func @transform_6(%arg0: i32) -> (i32, i32) {
    %c0_i32 = arith.constant 0 : i32
    %c0_i32_0 = arith.constant 0 : i32
    return %arg0, %c0_i32 : i32, i32
  }
  func.func @transform_7(%arg0: i32) -> (i32, i32) {
    %c0_i32 = arith.constant 0 : i32
    %c0_i32_0 = arith.constant 0 : i32
    return %arg0, %c0_i32 : i32, i32
  }
}

</mosaic_0001>

<bundles_post_ra>
// kernel: tpu_custom_call.1
= control target key start
LH: loop header
LB: loop body
LE: loop exit
PB: predicated region body
PF: predicated region fallthrough
CT: control target
= control target key end

     0   :  { %15 = vsyncpa [#allocation5], 0  ;;  %s1148_s0 = inlined_call_operand.hbm [shape: f32[8,512], index: 0, kind: input, shape index: {}]   ;;  %s1149_s1 = inlined_call_operand.hbm [shape: bf16[512,256], index: 1, kind: input, shape index: {}]   ;;  %s1150_s2 = inlined_call_operand.vmem [shape: f32[1,256], index: 2, kind: input, shape index: {}]   ;;  %s1151_s3 = inlined_call_operand.hbm [shape: bf16[256,128], index: 3, kind: input, shape index: {}]   ;;  %s1152_s4 = inlined_call_operand.<no memory space> [shape: f32[1,1], index: 4, kind: input, shape index: {}]   ;;  %s1153_s5 = inlined_call_operand.<no memory space> [shape: f32[1,1], index: 5, kind: input, shape index: {}]   ;;  %s1154_s6 = inlined_call_operand.vmem [shape: f32[8,1], index: 6, kind: output, shape index: {0}]   ;;  %s1155_s7 = inlined_call_operand.vmem [shape: f32[8,1], index: 7, kind: output, shape index: {1}]  }
   0x1   :  { %16 = vsyncpa [#allocation7], 0  ;;  %s1050_s24 = smov [#allocation6]   ;;  %s980_s28 = scalar_lea.hbm %s1149_s1, 8192 }
   0x2   :  { %s32_s25 = sshll.u32 %s1050_s24, 4  ;;  %p981_p0 = scmp.ne.s32.totalorder %s1149_s1, %s980_s28  ;;  %s33_s25 = int_to_ptr.vmem [resolvable:$true] %s32_s25 }
   0x3   :  { %p984_p1 = scmp.lt.u32.totalorder %s980_s28, %s1149_s1 }
   0x5   :  { %p986_p2 = pnand %p984_p1, %p981_p0 }
   0x7   :  { %989 = shalt.err (!%p986_p2)
}
   0x8   :  { %s990_s10 = scalar_lea.vmem %s33_s25, 8192  ;;  %p995_p4 = scmp.lt.s32.totalorder %s33_s25, %s33_s25 }
   0x9   :  { %p991_p3 = scmp.ne.s32.totalorder %s33_s25, %s990_s10  ;;  %p996_p5 = scmp.lt.s32.totalorder %s990_s10, %s990_s10 }
   0xb   :  { %p997_p6 = por %p996_p5, %p995_p4 }
   0xd   :  { %p998_p7 = pnand %p997_p6, %p991_p3 }
   0xf   :  { %1001 = shalt.err (!%p998_p7)
}
  0x10   :  { %s1051_s11 = smov 128   ;;  %s1052_s12 = smov 8  }
  0x11   :  { %38 = dma.hbm_to_vmem [thread:$0]  %s1149_s1, 8192, %s33_s25, [#allocation7], %s1051_s11, %s1051_s11, %s1052_s12  }
  0x12   :  { %s1053_s15 = smov [#allocation4]   ;;  %s1054_s17 = smov [#allocation8]  }
  0x13   :  { %s23_s16 = sshll.u32 %s1053_s15, 4  ;;  %s46_s18 = sshll.u32 %s1054_s17, 4  ;;  %s24_s16 = int_to_ptr.vmem [resolvable:$true] %s23_s16  ;;  %s47_s18 = int_to_ptr.vmem [resolvable:$true] %s46_s18 }
  0x14   :  { %s1002_s21 = scalar_lea.hbm %s1148_s0, 512 }
  0x15   :  { %p1003_p8 = scmp.ne.s32.totalorder %s1148_s0, %s1002_s21  ;;  %p1006_p9 = scmp.lt.u32.totalorder %s1002_s21, %s1148_s0 }
  0x17   :  { %p1008_p10 = pnand %p1006_p9, %p1003_p8 }
  0x19   :  { %1011 = shalt.err (!%p1008_p10)
}
  0x1a   :  { %s1012_s1 = scalar_lea.vmem %s24_s16, 512  ;;  %p1017_p12 = scmp.lt.s32.totalorder %s24_s16, %s24_s16 }
  0x1b   :  { %p1013_p11 = scmp.ne.s32.totalorder %s24_s16, %s1012_s1  ;;  %p1018_p13 = scmp.lt.s32.totalorder %s1012_s1, %s1012_s1 }
  0x1d   :  { %p1019_p0 = por %p1018_p13, %p1017_p12 }
  0x1f   :  { %p1020_p1 = pnand %p1019_p0, %p1013_p11 }
  0x21   :  { %1023 = shalt.err (!%p1020_p1)
}
  0x22   :  { %26 = dma.hbm_to_vmem [thread:$0]  %s1148_s0, 512, %s24_s16, [#allocation5]  }
  0x23   :  { %s1024_s30 = scalar_lea.hbm %s1151_s3, 2048 }
  0x24   :  { %p1025_p2 = scmp.ne.s32.totalorder %s1151_s3, %s1024_s30  ;;  %p1028_p3 = scmp.lt.u32.totalorder %s1024_s30, %s1151_s3 }
  0x26   :  { %p1030_p4 = pnand %p1028_p3, %p1025_p2 }
  0x28   :  { %1033 = shalt.err (!%p1030_p4)
}
  0x29   :  { %s1034_s12 = scalar_lea.vmem %s47_s18, 2048  ;;  %p1039_p6 = scmp.lt.s32.totalorder %s47_s18, %s47_s18 }
  0x2a   :  { %p1035_p5 = scmp.ne.s32.totalorder %s47_s18, %s1034_s12  ;;  %p1040_p7 = scmp.lt.s32.totalorder %s1034_s12, %s1034_s12 }
  0x2c   :  { %p1041_p8 = por %p1040_p7, %p1039_p6 }
  0x2e   :  { %p1042_p9 = pnand %p1041_p8, %p1035_p5 }
  0x30   :  { %1045 = shalt.err (!%p1042_p9)
}
  0x31   :  { %s1055_s0 = smov 64   ;;  %s1056_s13 = smov 4  }
  0x32   :  { %52 = dma.hbm_to_vmem [thread:$0]  %s1151_s3, 2048, %s47_s18, [#allocation7], %s1055_s0, %s1055_s0, %s1056_s13  }
  0x33   :  { %1046 = dma.done.wait [#allocation5], 512  }
  0x34   :  { %1047 = vsyncadd [#allocation5], 4294966784 }
  0x35   :  { %1048 = dma.done.wait [#allocation7], 10240  }
  0x36   :  { %1049 = vsyncadd [#allocation7], 4294957056  ;;  %v864_v0 = vld [vmem:[#allocation6 + $0x4] ss:$8 sps:$4 sm:$0xff]   ;;  %v868_v2 = vld [vmem:[#allocation6] ss:$8 sps:$4 sm:$0xff]  }
  0x37   :  { %v866_v1 = vld [vmem:[#allocation6 + $0x104] ss:$8 sps:$4 sm:$0xff]   ;;  %471 = vmatprep.subr.bf16.mxu1 %v864_v0  ;;  %v869_v3 = vld [vmem:[#allocation6 + $0x100] ss:$8 sps:$4 sm:$0xff]   ;;  %v870_v4 = vld [vmem:[#allocation6 + $0x14] ss:$8 sps:$4 sm:$0xff]  }
  0x38   :  { %512 = vmatprep.subr.bf16.mxu0 %v866_v1  ;;  %472 = vmatpush1.bf16.msra.mxu1 %v868_v2  ;;  %v872_v5 = vld [vmem:[#allocation6 + $0x114] ss:$8 sps:$4 sm:$0xff]   ;;  %v874_v6 = vld [vmem:[#allocation6 + $0x10] ss:$8 sps:$4 sm:$0xff]   ;;  %v876_v8 = vld [vmem:[#allocation6 + $0x24] ss:$8 sps:$4 sm:$0xff]  }
  0x39   :  { %513 = vmatpush1.bf16.msra.mxu0 %v869_v3  ;;  %473 = vmatprep.subr.bf16.mxu1 %v870_v4  ;;  %v875_v7 = vld [vmem:[#allocation6 + $0x110] ss:$8 sps:$4 sm:$0xff]   ;;  %v878_v9 = vld [vmem:[#allocation6 + $0x124] ss:$8 sps:$4 sm:$0xff]   ;;  %v880_v10 = vld [vmem:[#allocation6 + $0x20] ss:$8 sps:$4 sm:$0xff]  }
  0x3a   :  { %514 = vmatprep.subr.bf16.mxu0 %v872_v5  ;;  %v881_v11 = vld [vmem:[#allocation6 + $0x120] ss:$8 sps:$4 sm:$0xff]   ;;  %v882_v12 = vld [vmem:[#allocation6 + $0x34] ss:$8 sps:$4 sm:$0xff]   ;;  %v886_v14 = vld [vmem:[#allocation6 + $0x30] ss:$8 sps:$4 sm:$0xff]  }
  0x3b   :  { %v884_v13 = vld [vmem:[#allocation6 + $0x134] ss:$8 sps:$4 sm:$0xff]   ;;  %v887_v15 = vld [vmem:[#allocation6 + $0x130] ss:$8 sps:$4 sm:$0xff]   ;;  %v888_v16 = vld [vmem:[#allocation6 + $0x44] ss:$8 sps:$4 sm:$0xff]  }
  0x3c   :  { %474 = vmatpush1.bf16.msra.mxu1 %v874_v6  ;;  %v890_v17 = vld [vmem:[#allocation6 + $0x144] ss:$8 sps:$4 sm:$0xff]   ;;  %v892_v18 = vld [vmem:[#allocation6 + $0x40] ss:$8 sps:$4 sm:$0xff]   ;;  %v894_v20 = vld [vmem:[#allocation6 + $0x54] ss:$8 sps:$4 sm:$0xff]  }
  0x3d   :  { %515 = vmatpush1.bf16.msra.mxu0 %v875_v7  ;;  %475 = vmatprep.subr.bf16.mxu1 %v876_v8  ;;  %v893_v19 = vld [vmem:[#allocation6 + $0x140] ss:$8 sps:$4 sm:$0xff]   ;;  %v896_v21 = vld [vmem:[#allocation6 + $0x154] ss:$8 sps:$4 sm:$0xff]   ;;  %v898_v22 = vld [vmem:[#allocation6 + $0x50] ss:$8 sps:$4 sm:$0xff]  }
  0x3e   :  { %516 = vmatprep.subr.bf16.mxu0 %v878_v9  ;;  %v899_v23 = vld [vmem:[#allocation6 + $0x150] ss:$8 sps:$4 sm:$0xff]   ;;  %v900_v24 = vld [vmem:[#allocation6 + $0x64] ss:$8 sps:$4 sm:$0xff]   ;;  %v904_v26 = vld [vmem:[#allocation6 + $0x60] ss:$8 sps:$4 sm:$0xff]  }
  0x3f   :  { %v902_v25 = vld [vmem:[#allocation6 + $0x164] ss:$8 sps:$4 sm:$0xff]   ;;  %v905_v27 = vld [vmem:[#allocation6 + $0x160] ss:$8 sps:$4 sm:$0xff]   ;;  %v906_v28 = vld [vmem:[#allocation6 + $0x74] ss:$8 sps:$4 sm:$0xff]  }
  0x40   :  { %476 = vmatpush1.bf16.msra.mxu1 %v880_v10  ;;  %v908_v29 = vld [vmem:[#allocation6 + $0x174] ss:$8 sps:$4 sm:$0xff]   ;;  %v910_v30 = vld [vmem:[#allocation6 + $0x70] ss:$8 sps:$4 sm:$0xff]   ;;  %v912_v32 = vld [vmem:[#allocation6 + $0x84] ss:$8 sps:$4 sm:$0xff]  }
  0x41   :  { %517 = vmatpush1.bf16.msra.mxu0 %v881_v11  ;;  %477 = vmatprep.subr.bf16.mxu1 %v882_v12  ;;  %v911_v31 = vld [vmem:[#allocation6 + $0x170] ss:$8 sps:$4 sm:$0xff]   ;;  %v914_v33 = vld [vmem:[#allocation6 + $0x184] ss:$8 sps:$4 sm:$0xff]   ;;  %v916_v34 = vld [vmem:[#allocation6 + $0x80] ss:$8 sps:$4 sm:$0xff]  }
  0x42   :  { %518 = vmatprep.subr.bf16.mxu0 %v884_v13  ;;  %v917_v35 = vld [vmem:[#allocation6 + $0x180] ss:$8 sps:$4 sm:$0xff]   ;;  %v918_v36 = vld [vmem:[#allocation6 + $0x94] ss:$8 sps:$4 sm:$0xff]   ;;  %v922_v38 = vld [vmem:[#allocation6 + $0x90] ss:$8 sps:$4 sm:$0xff]  }
  0x43   :  { %v920_v37 = vld [vmem:[#allocation6 + $0x194] ss:$8 sps:$4 sm:$0xff]   ;;  %v923_v39 = vld [vmem:[#allocation6 + $0x190] ss:$8 sps:$4 sm:$0xff]   ;;  %v924_v40 = vld [vmem:[#allocation6 + $0xa4] ss:$8 sps:$4 sm:$0xff]  }
  0x44   :  { %478 = vmatpush1.bf16.msra.mxu1 %v886_v14  ;;  %v926_v41 = vld [vmem:[#allocation6 + $0x1a4] ss:$8 sps:$4 sm:$0xff]   ;;  %v928_v42 = vld [vmem:[#allocation6 + $0xa0] ss:$8 sps:$4 sm:$0xff]   ;;  %v930_v44 = vld [vmem:[#allocation6 + $0xb4] ss:$8 sps:$4 sm:$0xff]  }
  0x45   :  { %519 = vmatpush1.bf16.msra.mxu0 %v887_v15  ;;  %479 = vmatprep.subr.bf16.mxu1 %v888_v16  ;;  %v929_v43 = vld [vmem:[#allocation6 + $0x1a0] ss:$8 sps:$4 sm:$0xff]   ;;  %v932_v45 = vld [vmem:[#allocation6 + $0x1b4] ss:$8 sps:$4 sm:$0xff]   ;;  %v934_v47 = vld [vmem:[#allocation6 + $0xb0] ss:$8 sps:$4 sm:$0xff]  }
  0x46   :  { %520 = vmatprep.subr.bf16.mxu0 %v890_v17  ;;  %v68_v46 = vld [vmem:[#allocation4 + $0x8] sm:$0xff]  ;;  %v935_v48 = vld [vmem:[#allocation6 + $0x1b0] ss:$8 sps:$4 sm:$0xff]   ;;  %v942_v56 = vld [vmem:[#allocation6 + $0xd4] ss:$8 sps:$4 sm:$0xff]   ;;  %vm734_vm0 = vcmask 7168  }
  0x47   :  { %v72_v49 = vpack.c.bf16 %v68_v46, %v68_v46  ;;  %v70_v50 = vld [vmem:[#allocation4 + $0x18] sm:$0xff]  ;;  %v936_v51 = vld [vmem:[#allocation6 + $0xc4] ss:$8 sps:$4 sm:$0xff]   ;;  %v940_v54 = vld [vmem:[#allocation6 + $0xc0] ss:$8 sps:$4 sm:$0xff]  }
  0x48   :  { %480 = vmatpush1.bf16.msra.mxu1 %v892_v18  ;;  %v74_v52 = vpack.c.bf16 %v70_v50, %v70_v50  ;;  %v938_v53 = vld [vmem:[#allocation6 + $0x1c4] ss:$8 sps:$4 sm:$0xff]   ;;  %v941_v55 = vld [vmem:[#allocation6 + $0x1c0] ss:$8 sps:$4 sm:$0xff]   ;;  %v944_v57 = vld [vmem:[#allocation6 + $0x1d4] ss:$8 sps:$4 sm:$0xff]  }
  0x49   :  { %521 = vmatpush1.bf16.msra.mxu0 %v893_v19  ;;  %481 = vmatprep.subr.bf16.mxu1 %v894_v20  ;;  %v946_v58 = vld [vmem:[#allocation6 + $0xd0] ss:$8 sps:$4 sm:$0xff]   ;;  %v948_v60 = vld [vmem:[#allocation6 + $0xe4] ss:$8 sps:$4 sm:$0xff]   ;;  %v952_v62 = vld [vmem:[#allocation6 + $0xe0] ss:$8 sps:$4 sm:$0xff]  }
  0x4a   :  { %522 = vmatprep.subr.bf16.mxu0 %v896_v21  ;;  %503 = vmatprep.mubr.bf16.mxu1 %v72_v49  ;;  %v947_v59 = vld [vmem:[#allocation6 + $0x1d0] ss:$8 sps:$4 sm:$0xff]   ;;  %v950_v61 = vld [vmem:[#allocation6 + $0x1e4] ss:$8 sps:$4 sm:$0xff]   ;;  %v953_v63 = vld [vmem:[#allocation6 + $0x1e0] ss:$8 sps:$4 sm:$0xff]   ;;  %v726_v49 = vstv %s1152_s4 }
  0x4b   :  { %544 = vmatprep.mubr.bf16.mxu0 %v74_v52  ;;  %v954_v0 = vld [vmem:[#allocation6 + $0xf4] ss:$8 sps:$4 sm:$0xff]   ;;  %v958_v2 = vld [vmem:[#allocation6 + $0xf0] ss:$8 sps:$4 sm:$0xff]   ;;  %v67_v4 = vld [vmem:[#allocation4] sm:$0xff] }
  0x4c   :  { %482 = vmatpush1.bf16.msra.mxu1 %v898_v22  ;;  %v956_v1 = vld [vmem:[#allocation6 + $0x1f4] ss:$8 sps:$4 sm:$0xff]   ;;  %v959_v3 = vld [vmem:[#allocation6 + $0x1f0] ss:$8 sps:$4 sm:$0xff]   ;;  %v960_v6 = vld [vmem:[#allocation8 + $0x40] sm:$0xff]   ;;  %v71_v7 = vpack.c.bf16 %v67_v4, %v67_v4 }
  0x4d   :  { %523 = vmatpush1.bf16.msra.mxu0 %v899_v23  ;;  %483 = vmatprep.subr.bf16.mxu1 %v900_v24  ;;  %v69_v5 = vld [vmem:[#allocation4 + $0x10] sm:$0xff]  ;;  %v961_v9 = vld [vmem:[#allocation8] sm:$0xff]   ;;  %v962_v10 = vld [vmem:[#allocation8 + $0x48] sm:$0xff]   ;;  %v141_v24 = vlaneseq }
  0x4e   :  { %524 = vmatprep.subr.bf16.mxu0 %v902_v25  ;;  %v73_v8 = vpack.c.bf16 %v69_v5, %v69_v5  ;;  %v963_v11 = vld [vmem:[#allocation8 + $0x8] sm:$0xff]   ;;  %v964_v12 = vld [vmem:[#allocation8 + $0x50] sm:$0xff]   ;;  %v966_v14 = vld [vmem:[#allocation8 + $0x58] sm:$0xff]  }
  0x4f   :  { %v965_v13 = vld [vmem:[#allocation8 + $0x10] sm:$0xff]   ;;  %v967_v15 = vld [vmem:[#allocation8 + $0x18] sm:$0xff]   ;;  %v968_v16 = vld [vmem:[#allocation8 + $0x60] sm:$0xff]   ;;  %v142_v25 = vshrl.u32 %v141_v24, 7 }
  0x50   :  { %484 = vmatpush1.bf16.msra.mxu1 %v904_v26  ;;  %v969_v17 = vld [vmem:[#allocation8 + $0x20] sm:$0xff]   ;;  %v970_v18 = vld [vmem:[#allocation8 + $0x68] sm:$0xff]   ;;  %v972_v20 = vld [vmem:[#allocation8 + $0x70] sm:$0xff]  }
  0x51   :  { %525 = vmatpush1.bf16.msra.mxu0 %v905_v27  ;;  %485 = vmatprep.subr.bf16.mxu1 %v906_v28  ;;  %v971_v19 = vld [vmem:[#allocation8 + $0x28] sm:$0xff]   ;;  %v973_v21 = vld [vmem:[#allocation8 + $0x30] sm:$0xff]   ;;  %v974_v22 = vld [vmem:[#allocation8 + $0x78] sm:$0xff]   ;;  %v143_v26 = vsub.s32 0, %v142_v25  ;;  %v147_v28 = vsub.s32 1, %v142_v25 }
  0x52   :  { %526 = vmatprep.subr.bf16.mxu0 %v908_v29  ;;  %v975_v23 = vld [vmem:[#allocation8 + $0x38] sm:$0xff]   ;;  %v139_v27 = vld [vmem:[%s1150_s2] sm:$0x3] }
  0x53   :  { %v144_v29 = vrot.slane %v139_v27, %v143_v26 }
  0x54   :  { %486 = vmatpush1.bf16.msra.mxu1 %v910_v30  ;;  %v148_v30 = vrot.slane %v139_v27, %v147_v28 }
  0x55   :  { %527 = vmatpush1.bf16.msra.mxu0 %v911_v31  ;;  %487 = vmatprep.subr.bf16.mxu1 %v912_v32 }
  0x56   :  { %528 = vmatprep.subr.bf16.mxu0 %v914_v33 }
  0x58   :  { %488 = vmatpush1.bf16.msra.mxu1 %v916_v34 }
  0x59   :  { %529 = vmatpush1.bf16.msra.mxu0 %v917_v35  ;;  %489 = vmatprep.subr.bf16.mxu1 %v918_v36 }
  0x5a   :  { %530 = vmatprep.subr.bf16.mxu0 %v920_v37 }
  0x5c   :  { %490 = vmatpush1.bf16.msra.mxu1 %v922_v38 }
  0x5d   :  { %531 = vmatpush1.bf16.msra.mxu0 %v923_v39  ;;  %491 = vmatprep.subr.bf16.mxu1 %v924_v40 }
  0x5e   :  { %532 = vmatprep.subr.bf16.mxu0 %v926_v41 }
  0x60   :  { %492 = vmatpush1.bf16.msra.mxu1 %v928_v42 }
  0x61   :  { %533 = vmatpush1.bf16.msra.mxu0 %v929_v43  ;;  %493 = vmatprep.subr.bf16.mxu1 %v930_v44 }
  0x62   :  { %534 = vmatprep.subr.bf16.mxu0 %v932_v45 }
  0x64   :  { %494 = vmatpush1.bf16.msra.mxu1 %v934_v47 }
  0x65   :  { %535 = vmatpush1.bf16.msra.mxu0 %v935_v48  ;;  %495 = vmatprep.subr.bf16.mxu1 %v936_v51 }
  0x66   :  { %536 = vmatprep.subr.bf16.mxu0 %v938_v53 }
  0x68   :  { %496 = vmatpush1.bf16.msra.mxu1 %v940_v54 }
  0x69   :  { %537 = vmatpush1.bf16.msra.mxu0 %v941_v55  ;;  %497 = vmatprep.subr.bf16.mxu1 %v942_v56 }
  0x6a   :  { %538 = vmatprep.subr.bf16.mxu0 %v944_v57  ;;  %v737_v57 = vstv %s1153_s5 }
  0x6c   :  { %498 = vmatpush1.bf16.msra.mxu1 %v946_v58 }
  0x6d   :  { %539 = vmatpush1.bf16.msra.mxu0 %v947_v59  ;;  %499 = vmatprep.subr.bf16.mxu1 %v948_v60 }
  0x6e   :  { %540 = vmatprep.subr.bf16.mxu0 %v950_v61 }
  0x70   :  { %500 = vmatpush1.bf16.msra.mxu1 %v952_v62 }
  0x71   :  { %541 = vmatpush1.bf16.msra.mxu0 %v953_v63  ;;  %501 = vmatprep.subr.bf16.mxu1 %v954_v0 }
  0x72   :  { %542 = vmatprep.subr.bf16.mxu0 %v956_v1 }
  0x74   :  { %502 = vmatpush1.bf16.msra.mxu1 %v958_v2 }
  0x75   :  { %543 = vmatpush1.bf16.msra.mxu0 %v959_v3  ;;  %831 = vmatprep.subr.bf16.mxu1 %v960_v6 }
  0x77   :  { %504 = vmatmul.mubr.bf16.vlgmr.msra.gmra.mrb[0].mxu1 %v71_v7 }
  0x78   :  { %545 = vmatmul.mubr.bf16.vlgmr.msra.gmra.mrb[0].mxu0 %v73_v8  ;;  %832 = vmatpush3.bf16.msra.mxu1 %v961_v9 }
  0x79   :  { %833 = vmatprep.subr.bf16.mxu1 %v962_v10 }
  0x7c   :  { %834 = vmatpush3.bf16.msra.mxu1 %v963_v11 }
  0x7d   :  { %835 = vmatprep.subr.bf16.mxu1 %v964_v12 }
  0x80   :  { %836 = vmatpush3.bf16.msra.mxu1 %v965_v13 }
  0x81   :  { %837 = vmatprep.subr.bf16.mxu1 %v966_v14 }
  0x84   :  { %838 = vmatpush3.bf16.msra.mxu1 %v967_v15 }
  0x85   :  { %839 = vmatprep.subr.bf16.mxu1 %v968_v16 }
  0x88   :  { %840 = vmatpush3.bf16.msra.mxu1 %v969_v17 }
  0x89   :  { %841 = vmatprep.subr.bf16.mxu1 %v970_v18 }
  0x8c   :  { %842 = vmatpush3.bf16.msra.mxu1 %v971_v19 }
  0x8d   :  { %843 = vmatprep.subr.bf16.mxu1 %v972_v20 }
  0x90   :  { %844 = vmatpush3.bf16.msra.mxu1 %v973_v21 }
  0x91   :  { %845 = vmatprep.subr.bf16.mxu1 %v974_v22 }
  0x94   :  { %846 = vmatpush3.bf16.msra.mxu1 %v975_v23 }
 0x14a   :  { %v505_v31 = vpop.f32.mrb[0].mxu1 }
 0x14b   :  { %v546_v32 = vpop.f32.mrb[0].mxu0  ;;  %v506_v33 = vadd.f32 %v505_v31, %v144_v29  ;;  %v507_v34 = vpop.f32.mrb[1].mxu1 }
 0x14c   :  { %v548_v35 = vpop.f32.mrb[1].mxu0  ;;  %v508_v36 = vadd.f32 %v507_v34, %v148_v30  ;;  %v509_v37 = vpop.f32.mrb[2].mxu1 }
 0x14d   :  { %v550_v38 = vpop.f32.mrb[2].mxu0  ;;  %v547_v39 = vadd.f32 %v546_v32, %v506_v33  ;;  %v510_v40 = vpop.f32.mrb[3].mxu1 }
 0x14e   :  { %v551_v41 = vpop.f32.mrb[3].mxu0  ;;  %v549_v42 = vadd.f32 %v548_v35, %v508_v36 }
 0x14f   :  { %v553_v43 = vmax.f32 %v547_v39, 0.0 }
 0x150   :  { %v554_v44 = vmax.f32 %v549_v42, 0.0 }
 0x151   :  { %v555_v46 = vpack.c.bf16 %v553_v43, %v553_v43 }
 0x152   :  { %v556_v45 = vpack.c.bf16 %v554_v44, %v554_v44 }
 0x154   :  { %717 = vmatprep.mubr.bf16.mxu1 %v556_v45 }
 0x155   :  { %718 = vmatmul.mubr.bf16.vlgmr.msra.gmra.mrb[4].mxu1 %v555_v46 }
 0x228   :  { %v847_v47 = vpop.f32.mrb[4].mxu1 }
 0x229   :  { %v848_v48 = vpop.f32.mrb[5].mxu1 }
 0x22a   :  { %v849_v50 = vadd.f32 %v848_v48, %v847_v47  ;;  %v850_v51 = vpop.f32.mrb[6].mxu1 }
 0x22b   :  { %v851_v52 = vpop.f32.mrb[7].mxu1 }
 0x22c   :  { %v727_v53 = vadd.f32 %v849_v50, %v726_v49 }
 0x22e   :  { %v830_v54 = vmul.f32 -1.442695, %v727_v53 }
 0x230   :  { %976 = vpow2.f32 %v830_v54 }
 0x23a   :  { %v977_v55 = vpop.eup %976 }
 0x23b   :  { %v731_v56 = vadd.f32 1.0, %v977_v55 }
 0x23d   :  { %978 = vrcp.f32 %v731_v56 }
 0x247   :  { %v979_v58 = vpop.eup %978 }
 0x248   :  { %735 = vst.msk [vmem:[%s1154_s6] sm:$0xff] %vm734_vm0, %v979_v58  ;;  %v738_v59 = vsub.f32 %v979_v58, %v737_v57 }
 0x24a   :  { %739 = vst.msk [vmem:[%s1155_s7] sm:$0xff] %vm734_vm0, %v738_v59 }
 0x24b   :  { %748 = vsyncpa [#allocation5], 1 }
 0x24c   :  { %749 = vsyncpa [#allocation7], 1 }

</bundles_post_ra>
